<compile_context>
chip_gen: v6e
topology: v6e:2x2x1
jax: 0.10.0
libtpu: 0.0.40
codegen_flags: <defaults>
</compile_context>

<pallas_src>
import math
import jax
import jax.numpy as jnp
from jax.experimental import pallas as pl
from jax.experimental.pallas import tpu as pltpu


TILE_TARGET = 512      # HW pixels per grid step (multiple of 128); 1024 also fine on v5e/v6e.
MIN_PALLAS_HW = 128    # levels with fewer pixels run in plain XLA


def _round_up(a, b):
    return ((a + b - 1) // b) * b


# ----------------------------------------------------------------------------
# Pallas kernel: one feature level, one (batch n, HW tile t) grid step.
# ----------------------------------------------------------------------------
def scene_relation_kernel(sf_ref,    # (C_out, 1)     f32  per-batch scene vector
                          x_ref,     # (C, TILE)      input pixels (original dtype)
                          w_ref,     # (2*C_out, C)   bf16 fused [Wc ; Wf]
                          b_ref,     # (2*C_out, 1)   f32  fused [bc ; bf]
                          out_ref):  # (C_out, TILE)  bf16
    c_out = out_ref.shape[0]

    # Single fused MXU matmul (content encoder + feature re-encoder), f32 acc.
    x = x_ref[...].astype(jnp.bfloat16)
    y = jnp.dot(w_ref[...], x, preferred_element_type=jnp.float32) + b_ref[...]

    cf = jnp.maximum(y[:c_out, :], 0.0)      # content features (conv+BN+ReLU)
    pf = jnp.maximum(y[c_out:, :], 0.0)      # re-encoded features (conv+BN+ReLU)

    # relation = sigmoid(sum_c sf_c * cf_c)  -> (1, TILE); sublane reduce (XLU).
    rel = jax.nn.sigmoid(jnp.sum(cf * sf_ref[...], axis=0, keepdims=True))
    out_ref[...] = (rel * pf).astype(out_ref.dtype)


def _vmem_limit_bytes(C, c_out, tile, x_itemsize, out_itemsize):
    """Rough per-level VMEM budget: double-buffered blocks + f32 temporaries."""
    x_blk = C * tile * x_itemsize
    out_blk = c_out * tile * out_itemsize
    params = 2 * c_out * C * 2 + 2 * c_out * 4 + c_out * 4
    work = 2 * c_out * tile * 4 * 2            # y / cf / pf f32 working set
    est = 2 * (x_blk + out_blk + params) + work + (8 << 20)
    return int(min(max(est, 32 << 20), 100 << 20))


def _scene_relation_level(sf3, x, w_cat, b_cat, tile, out_dtype):
    """sf3:(N,C_out,1) f32; x:(N,C,HW_pad); -> (N, C_out, HW_pad) out_dtype."""
    N, C, hw_pad = x.shape
    c_out = sf3.shape[1]
    grid = (N, hw_pad // tile)
    const = lambda n, t: (0, 0)
    vmem_limit = _vmem_limit_bytes(C, c_out, tile, x.dtype.itemsize,
                                   jnp.dtype(out_dtype).itemsize)

    return pl.pallas_call(
        scene_relation_kernel,
        out_shape=jax.ShapeDtypeStruct((N, c_out, hw_pad), out_dtype),
        grid_spec=pltpu.PrefetchScalarGridSpec(
            num_scalar_prefetch=0,
            grid=grid,
            in_specs=[
                pl.BlockSpec((None, c_out, 1), lambda n, t: (n, 0, 0)),   # scene vec
                pl.BlockSpec((None, C, tile), lambda n, t: (n, 0, t)),    # pixels
                pl.BlockSpec((2 * c_out, C), const),                      # fused W (resident)
                pl.BlockSpec((2 * c_out, 1), const),                      # fused b (resident)
            ],
            out_specs=pl.BlockSpec((None, c_out, tile), lambda n, t: (n, 0, t)),
        ),
        compiler_params=pltpu.CompilerParams(
            dimension_semantics=("parallel", "parallel"),
            vmem_limit_bytes=vmem_limit),
    )(sf3, x, w_cat, b_cat)


def _level_xla(sf, x, p, out_dtype):
    """Tiny-level fallback (HW < MIN_PALLAS_HW); NCHW-native, plain XLA."""
    cf = jnp.maximum(jnp.einsum('nci,co->noi', x, p["wc"]) + p["bc"].T[None], 0.0)
    pf = jnp.maximum(jnp.einsum('nci,co->noi', x, p["wf"]) + p["bf"].T[None], 0.0)
    rel = jax.nn.sigmoid(jnp.sum(cf * sf[:, :, None], axis=1, keepdims=True))
    return (rel * pf).astype(out_dtype)


def scene_relation_forward(scene_feature, features, params_list,
                           tile_target=TILE_TARGET, out_dtype=jnp.bfloat16):
    """scene_feature: (N, C_in, 1, 1) NCHW; features: list of (N, C_i, H, W)."""
    assert tile_target % 128 == 0
    s = scene_feature[:, :, 0, 0].astype(jnp.float32)                # (N, C_in)
    outs = []
    for feat, p in zip(features, params_list):
        N, C, H, W = feat.shape
        HW = H * W
        c_out = p["wc"].shape[1]

        # Hoisted scale-aware scene encoder (conv1x1 -> ReLU -> conv1x1), tiny.
        sf = jnp.maximum(s @ p["ws1"] + p["bs1"], 0.0) @ p["ws2"] + p["bs2"]   # (N, C_out)

        x = feat.reshape(N, C, HW)          # free reshape, stays NCHW
        if HW < MIN_PALLAS_HW:
            y = _level_xla(sf, x, p, out_dtype)
        else:
            # Fused (2*C_out, C) weight: [content ; re-encode] 1x1 convs, BN folded.
            w_cat = jnp.concatenate([p["wc"].T, p["wf"].T], axis=0).astype(jnp.bfloat16)
            b_cat = jnp.concatenate([p["bc"], p["bf"]], axis=1).T.astype(jnp.float32)

            hw_pad = _round_up(HW, 128)
            tile = hw_pad if hw_pad <= tile_target else tile_target
            hw_pad = _round_up(HW, tile)
            if hw_pad != HW:
                x = jnp.pad(x, ((0, 0), (0, 0), (0, hw_pad - HW)))
            sf3 = sf.astype(jnp.float32)[:, :, None]                 # (N, C_out, 1)

            y = _scene_relation_level(sf3, x, w_cat, b_cat, tile, out_dtype)
            if hw_pad != HW:
                y = y[:, :, :HW]
        outs.append(y.reshape(N, c_out, H, W))
    return outs


# ----------------------------------------------------------------------------
# Deterministic parameter construction (PyTorch-style init, BN folded).
# ----------------------------------------------------------------------------
def _conv_params(key, c_in, c_out):
    k1, k2 = jax.random.split(key)
    bound = 1.0 / math.sqrt(c_in)     # 1x1 kernel fan-in
    w = jax.random.uniform(k1, (c_out, c_in), jnp.float32, -bound, bound)
    b = jax.random.uniform(k2, (c_out,), jnp.float32, -bound, bound)
    return w, b


def _bn_params(key, c):
    k1, k2, k3, k4 = jax.random.split(key, 4)
    gamma = jax.random.uniform(k1, (c,), jnp.float32, 0.5, 1.5)
    beta = jax.random.uniform(k2, (c,), jnp.float32, -0.5, 0.5)
    mean = 0.1 * jax.random.normal(k3, (c,), jnp.float32)
    var = jax.random.uniform(k4, (c,), jnp.float32, 0.5, 1.5)
    return gamma, beta, mean, var


def _fold_conv_bn(w, b, gamma, beta, mean, var, eps=1e-5):
    scale = gamma / jnp.sqrt(var + eps)
    w_eff = (w * scale[:, None]).T                 # (c_in, c_out)
    b_eff = (b - mean) * scale + beta
    return w_eff, b_eff[None, :]


def init_params(key, in_channels, channel_list, out_channels):
    params = []
    for i, c in enumerate(channel_list):
        ks = jax.random.split(jax.random.fold_in(key, i), 6)
        # scale-aware scene encoder (no BN)
        w1, b1 = _conv_params(ks[0], in_channels, out_channels)
        w2, b2 = _conv_params(ks[1], out_channels, out_channels)
        # content encoder: conv + BN (+ ReLU)
        wc, bc = _conv_params(ks[2], c, out_channels)
        wc_f, bc_f = _fold_conv_bn(wc, bc, *_bn_params(ks[3], out_channels))
        # feature re-encoder: conv + BN (+ ReLU)
        wf, bf = _conv_params(ks[4], c, out_channels)
        wf_f, bf_f = _fold_conv_bn(wf, bf, *_bn_params(ks[5], out_channels))
        params.append(dict(
            ws1=w1.T, bs1=b1[None, :], ws2=w2.T, bs2=b2[None, :],
            wc=wc_f, bc=bc_f, wf=wf_f, bf=bf_f))
    return params


# ----------------------------------------------------------------------------
# Pure-JAX f32 reference (module semantics, unfused math), used for validation.
# ----------------------------------------------------------------------------
def reference_forward(scene_feature, features, params_list):
    s = scene_feature[:, :, 0, 0]
    outs = []
    for feat, p in zip(features, params_list):
        N, C, H, W = feat.shape
        x = feat.reshape(N, C, H * W)
        h = jnp.maximum(s @ p["ws1"] + p["bs1"], 0.0)
        sf = h @ p["ws2"] + p["bs2"]                                  # (N, C_out)
        cf = jnp.maximum(jnp.einsum('nci,co->noi', x, p["wc"]) + p["bc"].T[None], 0.0)
        pf = jnp.maximum(jnp.einsum('nci,co->noi', x, p["wf"]) + p["bf"].T[None], 0.0)
        rel = jax.nn.sigmoid(jnp.sum(cf * sf[:, :, None], axis=1, keepdims=True))
        outs.append((rel * pf).reshape(N, -1, H, W))
    return outs


if __name__ == "__main__":
    key = jax.random.PRNGKey(0)
    N = 2
    in_channels = 32
    out_channels = 32
    channel_list = (32, 32, 32)
    # 1024 px (2 tiles), 400 px (single padded tile), 100 px (XLA fallback path)
    spatials = (32, 20, 10)

    keys = jax.random.split(key, 2 + len(spatials))
    scene_feature = jax.random.normal(keys[0], (N, in_channels, 1, 1), jnp.float32)
    features = [
        jax.random.normal(keys[1 + i], (N, channel_list[i], sp, sp), jnp.float32)
        for i, sp in enumerate(spatials)
    ]
    params = init_params(keys[-1], in_channels, channel_list, out_channels)

    fwd = jax.jit(lambda sfeat, feats: scene_relation_forward(sfeat, feats, params))
    outs = fwd(scene_feature, features)
    refs = reference_forward(scene_feature, features, params)

    for o, r in zip(outs, refs):
        jax.block_until_ready(o)
        assert o.shape == r.shape, (o.shape, r.shape)
        # bf16 operands/output (f32 accumulation) vs f32 reference -> modest tolerance
        if not jnp.allclose(o.astype(jnp.float32), r, rtol=3e-2, atol=3e-2):
            raise SystemExit("kernel/reference mismatch")

    print("KERNEL_OK")
</pallas_src>

<mosaic_0001>
module attributes {stable_mosaic.version = 11 : i64} {
  func.func @scene_relation_kernel(%arg0: i32, %arg1: i32, %arg2: memref<1x32x1xf32, #tpu.memory_space<vmem>>, %arg3: memref<1x32x512xf32, #tpu.memory_space<vmem>>, %arg4: memref<64x32xbf16, #tpu.memory_space<vmem>>, %arg5: memref<64x1xf32, #tpu.memory_space<vmem>>, %arg6: memref<1x32x512xbf16, #tpu.memory_space<vmem>>) attributes {dimension_semantics = [#tpu.dimension_semantics<parallel>, #tpu.dimension_semantics<parallel>], iteration_bounds = array<i64: 2, 2>, scalar_prefetch = 0 : i64, scratch_operands = 0 : i64, tpu.core_type = #tpu.core_type<tc>, window_params = [{transform_indices = @transform_0, window_bounds = array<i64: 1, 32, 1>}, {transform_indices = @transform_1, window_bounds = array<i64: 1, 32, 512>}, {pipeline_mode = #tpu.pipeline_mode<synchronous>, transform_indices = @transform_2, window_bounds = array<i64: 64, 32>}, {pipeline_mode = #tpu.pipeline_mode<synchronous>, transform_indices = @transform_3, window_bounds = array<i64: 64, 1>}, {transform_indices = @transform_4, window_bounds = array<i64: 1, 32, 512>}]} {
    %c0 = arith.constant 0 : index
    %c0_0 = arith.constant 0 : index
    %c0_1 = arith.constant 0 : index
    %0 = vector.load %arg3[%c0, %c0_0, %c0_1] : memref<1x32x512xf32, #tpu.memory_space<vmem>>, vector<1x32x512xf32>
    %1 = vector.shape_cast %0 : vector<1x32x512xf32> to vector<32x512xf32>
    %2 = arith.truncf %1 : vector<32x512xf32> to vector<32x512xbf16>
    %c0_2 = arith.constant 0 : index
    %c0_3 = arith.constant 0 : index
    %3 = vector.load %arg4[%c0_2, %c0_3] : memref<64x32xbf16, #tpu.memory_space<vmem>>, vector<64x32xbf16>
    %cst = arith.constant dense<0.000000e+00> : vector<64x512xf32>
    %4 = tpu.matmul %3, %2, %cst {dimension_numbers = #tpu.dot_dimension_numbers<[1], [0], [0], [1], [0, 0, 1, 1], [], []>} : vector<64x32xbf16>, vector<32x512xbf16>, vector<64x512xf32> -> vector<64x512xf32>
    %c0_4 = arith.constant 0 : index
    %c0_5 = arith.constant 0 : index
    %5 = vector.load %arg5[%c0_4, %c0_5] : memref<64x1xf32, #tpu.memory_space<vmem>>, vector<64x1xf32>
    %6 = vector.broadcast %5 : vector<64x1xf32> to vector<64x512xf32>
    %7 = arith.addf %4, %6 : vector<64x512xf32>
    %8 = vector.extract_strided_slice %7 {offsets = [0, 0], sizes = [32, 512], strides = [1, 1]} : vector<64x512xf32> to vector<32x512xf32>
    %cst_6 = arith.constant 0.000000e+00 : f32
    %9 = vector.broadcast %cst_6 : f32 to vector<32x512xf32>
    %10 = arith.maximumf %8, %9 : vector<32x512xf32>
    %11 = vector.extract_strided_slice %7 {offsets = [32, 0], sizes = [32, 512], strides = [1, 1]} : vector<64x512xf32> to vector<32x512xf32>
    %cst_7 = arith.constant 0.000000e+00 : f32
    %12 = vector.broadcast %cst_7 : f32 to vector<32x512xf32>
    %13 = arith.maximumf %11, %12 : vector<32x512xf32>
    %c0_8 = arith.constant 0 : index
    %c0_9 = arith.constant 0 : index
    %c0_10 = arith.constant 0 : index
    %14 = vector.load %arg2[%c0_8, %c0_9, %c0_10] : memref<1x32x1xf32, #tpu.memory_space<vmem>>, vector<1x32x1xf32>
    %15 = vector.shape_cast %14 : vector<1x32x1xf32> to vector<32x1xf32>
    %16 = vector.broadcast %15 : vector<32x1xf32> to vector<32x512xf32>
    %17 = arith.mulf %10, %16 : vector<32x512xf32>
    %cst_11 = arith.constant dense<0.000000e+00> : vector<512xf32>
    %18 = vector.multi_reduction <add>, %17, %cst_11 [0] : vector<32x512xf32> to vector<512xf32>
    %19 = vector.shape_cast %18 : vector<512xf32> to vector<1x512xf32>
    %20 = arith.negf %19 : vector<1x512xf32>
    %21 = math.exp %20 : vector<1x512xf32>
    %cst_12 = arith.constant 1.000000e+00 : f32
    %22 = vector.broadcast %cst_12 : f32 to vector<1x512xf32>
    %23 = arith.addf %22, %21 : vector<1x512xf32>
    %24 = arith.divf %22, %23 : vector<1x512xf32>
    %25 = vector.broadcast %24 : vector<1x512xf32> to vector<32x512xf32>
    %26 = arith.mulf %25, %13 : vector<32x512xf32>
    %27 = arith.truncf %26 : vector<32x512xf32> to vector<32x512xbf16>
    %c0_13 = arith.constant 0 : index
    %c0_14 = arith.constant 0 : index
    %c0_15 = arith.constant 0 : index
    %28 = vector.load %arg6[%c0_13, %c0_14, %c0_15] : memref<1x32x512xbf16, #tpu.memory_space<vmem>>, vector<1x32x512xbf16>
    %29 = vector.shape_cast %28 : vector<1x32x512xbf16> to vector<32x512xbf16>
    %30 = vector.shape_cast %27 : vector<32x512xbf16> to vector<1x32x512xbf16>
    tpu.vector_store %arg6[%c0_13, %c0_14, %c0_15], %30 {strides = array<i32>} : memref<1x32x512xbf16, #tpu.memory_space<vmem>>, vector<1x32x512xbf16>,
    return
  }
  func.func @transform_0(%arg0: i32, %arg1: i32) -> (i32, i32, i32) {
    %c0_i32 = arith.constant 0 : i32
    %c0_i32_0 = arith.constant 0 : i32
    %c0_i32_1 = arith.constant 0 : i32
    return %arg0, %c0_i32, %c0_i32_0 : i32, i32, i32
  }
  func.func @transform_1(%arg0: i32, %arg1: i32) -> (i32, i32, i32) {
    %c0_i32 = arith.constant 0 : i32
    %c0_i32_0 = arith.constant 0 : i32
    return %arg0, %c0_i32, %arg1 : i32, i32, i32
  }
  func.func @transform_2(%arg0: i32, %arg1: i32) -> (i32, i32) {
    %c0_i32 = arith.constant 0 : i32
    %c0_i32_0 = arith.constant 0 : i32
    %c0_i32_1 = arith.constant 0 : i32
    return %c0_i32, %c0_i32_0 : i32, i32
  }
  func.func @transform_3(%arg0: i32, %arg1: i32) -> (i32, i32) {
    %c0_i32 = arith.constant 0 : i32
    %c0_i32_0 = arith.constant 0 : i32
    %c0_i32_1 = arith.constant 0 : i32
    return %c0_i32, %c0_i32_0 : i32, i32
  }
  func.func @transform_4(%arg0: i32, %arg1: i32) -> (i32, i32, i32) {
    %c0_i32 = arith.constant 0 : i32
    %c0_i32_0 = arith.constant 0 : i32
    return %arg0, %c0_i32, %arg1 : i32, i32, i32
  }
}

module attributes {stable_mosaic.version = 11 : i64} {
  func.func @scene_relation_kernel(%arg0: i32, %arg1: i32, %arg2: memref<1x32x1xf32, #tpu.memory_space<vmem>>, %arg3: memref<1x32x512xf32, #tpu.memory_space<vmem>>, %arg4: memref<64x32xbf16, #tpu.memory_space<vmem>>, %arg5: memref<64x1xf32, #tpu.memory_space<vmem>>, %arg6: memref<1x32x512xbf16, #tpu.memory_space<vmem>>) attributes {dimension_semantics = [#tpu.dimension_semantics<parallel>, #tpu.dimension_semantics<parallel>], iteration_bounds = array<i64: 2, 1>, scalar_prefetch = 0 : i64, scratch_operands = 0 : i64, tpu.core_type = #tpu.core_type<tc>, window_params = [{transform_indices = @transform_0, window_bounds = array<i64: 1, 32, 1>}, {transform_indices = @transform_1, window_bounds = array<i64: 1, 32, 512>}, {pipeline_mode = #tpu.pipeline_mode<synchronous>, transform_indices = @transform_2, window_bounds = array<i64: 64, 32>}, {pipeline_mode = #tpu.pipeline_mode<synchronous>, transform_indices = @transform_3, window_bounds = array<i64: 64, 1>}, {transform_indices = @transform_4, window_bounds = array<i64: 1, 32, 512>}]} {
    %c0 = arith.constant 0 : index
    %c0_0 = arith.constant 0 : index
    %c0_1 = arith.constant 0 : index
    %0 = vector.load %arg3[%c0, %c0_0, %c0_1] : memref<1x32x512xf32, #tpu.memory_space<vmem>>, vector<1x32x512xf32>
    %1 = vector.shape_cast %0 : vector<1x32x512xf32> to vector<32x512xf32>
    %2 = arith.truncf %1 : vector<32x512xf32> to vector<32x512xbf16>
    %c0_2 = arith.constant 0 : index
    %c0_3 = arith.constant 0 : index
    %3 = vector.load %arg4[%c0_2, %c0_3] : memref<64x32xbf16, #tpu.memory_space<vmem>>, vector<64x32xbf16>
    %cst = arith.constant dense<0.000000e+00> : vector<64x512xf32>
    %4 = tpu.matmul %3, %2, %cst {dimension_numbers = #tpu.dot_dimension_numbers<[1], [0], [0], [1], [0, 0, 1, 1], [], []>} : vector<64x32xbf16>, vector<32x512xbf16>, vector<64x512xf32> -> vector<64x512xf32>
    %c0_4 = arith.constant 0 : index
    %c0_5 = arith.constant 0 : index
    %5 = vector.load %arg5[%c0_4, %c0_5] : memref<64x1xf32, #tpu.memory_space<vmem>>, vector<64x1xf32>
    %6 = vector.broadcast %5 : vector<64x1xf32> to vector<64x512xf32>
    %7 = arith.addf %4, %6 : vector<64x512xf32>
    %8 = vector.extract_strided_slice %7 {offsets = [0, 0], sizes = [32, 512], strides = [1, 1]} : vector<64x512xf32> to vector<32x512xf32>
    %cst_6 = arith.constant 0.000000e+00 : f32
    %9 = vector.broadcast %cst_6 : f32 to vector<32x512xf32>
    %10 = arith.maximumf %8, %9 : vector<32x512xf32>
    %11 = vector.extract_strided_slice %7 {offsets = [32, 0], sizes = [32, 512], strides = [1, 1]} : vector<64x512xf32> to vector<32x512xf32>
    %cst_7 = arith.constant 0.000000e+00 : f32
    %12 = vector.broadcast %cst_7 : f32 to vector<32x512xf32>
    %13 = arith.maximumf %11, %12 : vector<32x512xf32>
    %c0_8 = arith.constant 0 : index
    %c0_9 = arith.constant 0 : index
    %c0_10 = arith.constant 0 : index
    %14 = vector.load %arg2[%c0_8, %c0_9, %c0_10] : memref<1x32x1xf32, #tpu.memory_space<vmem>>, vector<1x32x1xf32>
    %15 = vector.shape_cast %14 : vector<1x32x1xf32> to vector<32x1xf32>
    %16 = vector.broadcast %15 : vector<32x1xf32> to vector<32x512xf32>
    %17 = arith.mulf %10, %16 : vector<32x512xf32>
    %cst_11 = arith.constant dense<0.000000e+00> : vector<512xf32>
    %18 = vector.multi_reduction <add>, %17, %cst_11 [0] : vector<32x512xf32> to vector<512xf32>
    %19 = vector.shape_cast %18 : vector<512xf32> to vector<1x512xf32>
    %20 = arith.negf %19 : vector<1x512xf32>
    %21 = math.exp %20 : vector<1x512xf32>
    %cst_12 = arith.constant 1.000000e+00 : f32
    %22 = vector.broadcast %cst_12 : f32 to vector<1x512xf32>
    %23 = arith.addf %22, %21 : vector<1x512xf32>
    %24 = arith.divf %22, %23 : vector<1x512xf32>
    %25 = vector.broadcast %24 : vector<1x512xf32> to vector<32x512xf32>
    %26 = arith.mulf %25, %13 : vector<32x512xf32>
    %27 = arith.truncf %26 : vector<32x512xf32> to vector<32x512xbf16>
    %c0_13 = arith.constant 0 : index
    %c0_14 = arith.constant 0 : index
    %c0_15 = arith.constant 0 : index
    %28 = vector.load %arg6[%c0_13, %c0_14, %c0_15] : memref<1x32x512xbf16, #tpu.memory_space<vmem>>, vector<1x32x512xbf16>
    %29 = vector.shape_cast %28 : vector<1x32x512xbf16> to vector<32x512xbf16>
    %30 = vector.shape_cast %27 : vector<32x512xbf16> to vector<1x32x512xbf16>
    tpu.vector_store %arg6[%c0_13, %c0_14, %c0_15], %30 {strides = array<i32>} : memref<1x32x512xbf16, #tpu.memory_space<vmem>>, vector<1x32x512xbf16>,
    return
  }
  func.func @transform_0(%arg0: i32, %arg1: i32) -> (i32, i32, i32) {
    %c0_i32 = arith.constant 0 : i32
    %c0_i32_0 = arith.constant 0 : i32
    %c0_i32_1 = arith.constant 0 : i32
    return %arg0, %c0_i32, %c0_i32_0 : i32, i32, i32
  }
  func.func @transform_1(%arg0: i32, %arg1: i32) -> (i32, i32, i32) {
    %c0_i32 = arith.constant 0 : i32
    %c0_i32_0 = arith.constant 0 : i32
    return %arg0, %c0_i32, %arg1 : i32, i32, i32
  }
  func.func @transform_2(%arg0: i32, %arg1: i32) -> (i32, i32) {
    %c0_i32 = arith.constant 0 : i32
    %c0_i32_0 = arith.constant 0 : i32
    %c0_i32_1 = arith.constant 0 : i32
    return %c0_i32, %c0_i32_0 : i32, i32
  }
  func.func @transform_3(%arg0: i32, %arg1: i32) -> (i32, i32) {
    %c0_i32 = arith.constant 0 : i32
    %c0_i32_0 = arith.constant 0 : i32
    %c0_i32_1 = arith.constant 0 : i32
    return %c0_i32, %c0_i32_0 : i32, i32
  }
  func.func @transform_4(%arg0: i32, %arg1: i32) -> (i32, i32, i32) {
    %c0_i32 = arith.constant 0 : i32
    %c0_i32_0 = arith.constant 0 : i32
    return %arg0, %c0_i32, %arg1 : i32, i32, i32
  }
}

</mosaic_0001>

<bundles_post_ra>
// kernel: _lambda_.2
= control target key start
LH: loop header
LB: loop body
LE: loop exit
PB: predicated region body
PF: predicated region fallthrough
CT: control target
= control target key end

     0   :  { %s1088_s15 = smov 0   ;;  %s1090_s16 = smov 0   ;;  %s1268_s0 = inlined_call_operand.vmem [shape: f32[2,32,1], index: 0, kind: input, shape index: {}]   ;;  %s1269_s1 = inlined_call_operand.vmem [shape: f32[2,32,1024], index: 1, kind: input, shape index: {}]   ;;  %s1270_s2 = inlined_call_operand.vmem [shape: bf16[64,32], index: 2, kind: input, shape index: {}]   ;;  %s1271_s3 = inlined_call_operand.vmem [shape: f32[64,1], index: 3, kind: input, shape index: {}]   ;;  %s1272_s4 = inlined_call_operand.vmem [shape: bf16[2,32,1024], index: 4, kind: output, shape index: {}]  }
   0x1   :  { %s1092_s17 = smov 0   ;;  %s1094_s18 = smov 0  }
   0x2   :  { %s1096_s19 = smov 0   ;;  %s1098_s20 = smov 0  }
   0x3   :  { %s1100_s21 = smov 0  }
   0x4 LB: > { %s23_s22 = sadd.s32 1, %s1052_s19  ;;  %s26_s23 = sadd.s32 1, %s1056_s20  ;;  %s1060_s21 = sphi %s1100_s21, %s14_s21   ;;  %s1056_s20 = sphi %s1098_s20, %s1279_s20   ;;  %s1052_s19 = sphi %s1096_s19, %s1278_s19   ;;  %s1048_s18 = sphi %s1094_s18, %s1277_s18   ;;  %s1044_s17 = sphi %s1092_s17, %s1276_s17   ;;  %s1040_s16 = sphi %s1090_s16, %s1275_s16   ;;  %s1036_s15 = sphi %s1088_s15, %s1274_s15  }
   0x5   : > { %p24_p0 = scmp.ge.s32.totalorder %s23_s22, 2  ;;  %s875_s24 = sadd.s32 4294967295, %s1060_s21  }
   0x6   : > { %p68_p1 = scmp.ne.s32.totalorder %s1040_s16, %s1036_s15  ;;  %p69_p2 = scmp.eq.s32.totalorder %s1060_s21, 0 }
   0x7   : > { %s1281_s22 = smov (%p24_p0, %s23_s22), 0  ;;  %s1283_s23 = smov (!%p24_p0, %s26_s23), %s1056_s20 }
   0x8   : > { %p28_p3 = scmp.ge.s32.totalorder %s1283_s23, 2  ;;  %p142_p4 = scmp.eq.s32.totalorder %s875_s24, 3 }
   0x9   : > { %s57_s25 = ssub.s32 %s1052_s19, %s1281_s22  ;;  %p70_p5 = por %p69_p2, %p68_p1 }
   0xa   : > { %s1285_s23 = smov (%p28_p3, %s1283_s23), 0  ;;  %p1136_p6 = por %p142_p4, %p68_p1 }
   0xb   : > { %s56_s27 = ssub.s32 %s1056_s20, %s1285_s23  ;;  %s61_s29 = sadd.s32 1, %s1040_s16 }
   0xc   : > { %s58_s28 = sor.u32 %s57_s25, %s56_s27  ;;  %p878_p8 = scmp.ge.s32.totalorder %s1060_s21, 4 }
   0xd   : > { %p59_p7 = scmp.eq.s32.totalorder %s58_s28, 0 }
   0xe   : > { %170 = sbr.rel (%p878_p8) target bundleno = 34 (0x22), region = 24 }
   0xf   : > { %s1144_s30 = scalar_select %p59_p7, %s1040_s16, %s61_s29  }
  0x13   : > { %181 = sbr.rel (!%p70_p5) target bundleno = 34 (0x22), region = 32  ;;  %s183_s5 = sand.u32 (%p70_p5), 1, %s1040_s16  }
  0x14   : > { %s880_s6 = sshll.u32 (%p70_p5), %s1052_s19, 2  ;;  %s879_s7 = sshll.u32 (%p70_p5), %s183_s5, 7 }
  0x15   : > { %s881_s8 = sshll.u32 (%p70_p5), %s1056_s20, 5  ;;  %s185_s14 = scalar_lea.vmem (%p70_p5), [#allocation2], %s879_s7 }
  0x16   : > { %s188_s9 = sadd.s32 (%p70_p5), %s881_s8, %s880_s6 }
  0x17   : > { %s882_s10 = sshll.u32 (%p70_p5), %s188_s9, 3 }
  0x18   : > { %s1153_s13 = scalar_lea.vmem %s1269_s1, %s882_s10 }
  0x19   : > { %v203_v0 = vld [vmem:[%s1153_s13] sm:$0xff]  ;;  %v205_v1 = vld [vmem:[%s1153_s13 + $0x8] sm:$0xff]  ;;  %v207_v2 = vld [vmem:[%s1153_s13 + $0x10] sm:$0xff] }
  0x1a   : > { %204 = vst [vmem:[%s185_s14] sm:$0xff] %v203_v0  ;;  %206 = vst [vmem:[%s185_s14 + $0x8] sm:$0xff] %v205_v1  ;;  %v209_v3 = vld [vmem:[%s1153_s13 + $0x18] sm:$0xff]  ;;  %v211_v4 = vld [vmem:[%s1153_s13 + $0x40] sm:$0xff] }
  0x1b   : > { %208 = vst [vmem:[%s185_s14 + $0x10] sm:$0xff] %v207_v2  ;;  %v213_v5 = vld [vmem:[%s1153_s13 + $0x48] sm:$0xff]  ;;  %210 = vst [vmem:[%s185_s14 + $0x18] sm:$0xff] %v209_v3  ;;  %v215_v6 = vld [vmem:[%s1153_s13 + $0x50] sm:$0xff] }
  0x1c   : > { %212 = vst [vmem:[%s185_s14 + $0x20] sm:$0xff] %v211_v4  ;;  %214 = vst [vmem:[%s185_s14 + $0x28] sm:$0xff] %v213_v5  ;;  %v217_v7 = vld [vmem:[%s1153_s13 + $0x58] sm:$0xff]  ;;  %v219_v8 = vld [vmem:[%s1153_s13 + $0x80] sm:$0xff] }
  0x1d   : > { %216 = vst [vmem:[%s185_s14 + $0x30] sm:$0xff] %v215_v6  ;;  %218 = vst [vmem:[%s185_s14 + $0x38] sm:$0xff] %v217_v7  ;;  %v221_v9 = vld [vmem:[%s1153_s13 + $0x88] sm:$0xff]  ;;  %v223_v10 = vld [vmem:[%s1153_s13 + $0x90] sm:$0xff] }
  0x1e   : > { %220 = vst [vmem:[%s185_s14 + $0x40] sm:$0xff] %v219_v8  ;;  %v225_v11 = vld [vmem:[%s1153_s13 + $0x98] sm:$0xff]  ;;  %222 = vst [vmem:[%s185_s14 + $0x48] sm:$0xff] %v221_v9  ;;  %v227_v12 = vld [vmem:[%s1153_s13 + $0xc0] sm:$0xff] }
  0x1f   : > { %224 = vst [vmem:[%s185_s14 + $0x50] sm:$0xff] %v223_v10  ;;  %226 = vst [vmem:[%s185_s14 + $0x58] sm:$0xff] %v225_v11  ;;  %v229_v13 = vld [vmem:[%s1153_s13 + $0xc8] sm:$0xff]  ;;  %v231_v14 = vld [vmem:[%s1153_s13 + $0xd0] sm:$0xff] }
  0x20   : > { %228 = vst [vmem:[%s185_s14 + $0x60] sm:$0xff] %v227_v12  ;;  %230 = vst [vmem:[%s185_s14 + $0x68] sm:$0xff] %v229_v13  ;;  %v233_v15 = vld [vmem:[%s1153_s13 + $0xd8] sm:$0xff] }
  0x21   : > { %232 = vst [vmem:[%s185_s14 + $0x70] sm:$0xff] %v231_v14  ;;  %234 = vst [vmem:[%s185_s14 + $0x78] sm:$0xff] %v233_v15 }
  0x22 PF: > { %p883_p9 = scmp.ge.s32.totalorder %s1060_s21, 1  ;;  %p239_p10 = scmp.lt.s32.totalorder %s1060_s21, 5 }
  0x24   : > { %p240_p11 = pnand %p883_p9, %p239_p10 }
  0x25   : > { %s246_s24 = sand.u32 (!%p240_p11), 1, %s1036_s15   ;;  %p275_p12 = scmp.lt.s32.totalorder (!%p240_p11), %s1048_s18, 1 }
  0x26   : > { %243 = sbr.rel (%p240_p11) target bundleno = 330 (0x14a), region = 55  ;;  %s884_s25 = sshll.u32 (!%p240_p11), %s246_s24, 7 }
  0x27   : > { %s248_s27 = scalar_lea.vmem (!%p240_p11), [#allocation2], %s884_s25  ;;  %s885_s29 = sshll.u32 (!%p240_p11), %s246_s24, 6 }
  0x28   : > { %s274_s15 = scalar_lea.vmem (!%p240_p11), [#allocation3], %s885_s29 }
  0x2b   : > { %v1062_v16 = vmov 0   ;;  %v292_v17 = vld [vmem:[%s248_s27 + $0x48] sm:$0xff]  ;;  %v294_v19 = vld [vmem:[%s248_s27 + $0x58] sm:$0xff]  ;;  %v291_v22 = vld [vmem:[%s248_s27 + $0x40] sm:$0xff]  ;;  %s1182_s28 = scalar_select %p275_p12, %s1048_s18, 1  ;;  %vm383_vm0 = vcmask 261120  }
  0x2c   : > { %428 = vmatprep.mubr.bf16.mxu0 %v1062_v16  ;;  %501 = vmatprep.mubr.bf16.mxu1 %v1062_v16  ;;  %v296_v18 = vld [vmem:[%s248_s27 + $0x68] sm:$0xff]  ;;  %v298_v21 = vld [vmem:[%s248_s27 + $0x78] sm:$0xff]  ;;  %v295_v23 = vld [vmem:[%s248_s27 + $0x60] sm:$0xff]  ;;  %s913_s24 = sshll.u32 (%p1136_p6), %s1044_s17, 2  ;;  %s914_s5 = sshll.u32 (%p1136_p6), %s1048_s18, 5 }
  0x2d   : > { %984 = vset.pattern.permute.xlu0 %v1062_v16  ;;  %985 = vset.pattern.permute.xlu1 %v1062_v16  ;;  %v304_v20 = vpack.c.bf16 %v296_v18, %v292_v17  ;;  %v306_v24 = vpack.c.bf16 %v298_v21, %v294_v19  ;;  %v303_v25 = vpack.c.bf16 %v295_v23, %v291_v22  ;;  %v293_v26 = vld [vmem:[%s248_s27 + $0x50] sm:$0xff]  ;;  %v284_v28 = vld [vmem:[%s248_s27 + $0x8] sm:$0xff]  ;;  %v286_v31 = vld [vmem:[%s248_s27 + $0x18] sm:$0xff]  ;;  %s918_s6 = sshll.u32 %s1182_s28, 5 }
  0x2e   : > { %v297_v27 = vld [vmem:[%s248_s27 + $0x70] sm:$0xff]  ;;  %v288_v30 = vld [vmem:[%s248_s27 + $0x28] sm:$0xff]  ;;  %v290_v32 = vld [vmem:[%s248_s27 + $0x38] sm:$0xff]  ;;  %s279_s25 = scalar_lea.vmem %s1268_s0, %s918_s6  ;;  %s755_s6 = sadd.s32 (%p1136_p6), %s914_s5, %s913_s24 }
  0x2f   : > { %408 = vmatprep.subr.bf16.mxu0 %v304_v20  ;;  %v305_v29 = vpack.c.bf16 %v297_v27, %v293_v26  ;;  %481 = vmatprep.subr.bf16.mxu1 %v306_v24  ;;  %v300_v33 = vpack.c.bf16 %v288_v30, %v284_v28  ;;  %v302_v34 = vpack.c.bf16 %v290_v32, %v286_v31  ;;  %v283_v35 = vld [vmem:[%s248_s27] sm:$0xff]  ;;  %v285_v37 = vld [vmem:[%s248_s27 + $0x10] sm:$0xff]  ;;  %v316_v44 = vld [vmem:[%s1271_s3 + $0x8] sm:$0xff]  ;;  %s915_s7 = sshll.u32 (%p1136_p6), %s755_s6, 2 }
  0x30   : > { %409 = vmatpush1.bf16.msra.mxu0 %v303_v25  ;;  %v287_v36 = vld [vmem:[%s248_s27 + $0x20] sm:$0xff]  ;;  %v289_v39 = vld [vmem:[%s248_s27 + $0x30] sm:$0xff]  ;;  %v318_v45 = vld [vmem:[%s1271_s3 + $0x18] sm:$0xff]  ;;  %s757_s10 = scalar_lea.vmem (%p1136_p6), %s1272_s4, %s915_s7 }
  0x31   : > { %482 = vmatpush1.bf16.msra.mxu1 %v305_v29  ;;  %v299_v38 = vpack.c.bf16 %v287_v36, %v283_v35  ;;  %410 = vmatprep.subr.bf16.mxu0 %v300_v33  ;;  %v301_v40 = vpack.c.bf16 %v289_v39, %v285_v37  ;;  %v315_v41 = vld [vmem:[%s1271_s3] sm:$0xff]  ;;  %v317_v43 = vld [vmem:[%s1271_s3 + $0x10] sm:$0xff]  ;;  %v575_v47 = vld [vmem:[%s279_s25 + $0x8] sm:$0xff] }
  0x32   : > { %483 = vmatprep.subr.bf16.mxu1 %v302_v34  ;;  %v986_v42 = vld [vmem:[%s1270_s2] sm:$0xff]   ;;  %325 = vperm.xlu0 %984, %v315_v41   ;;  %v987_v48 = vld [vmem:[%s1270_s2 + $0x8] sm:$0xff]   ;;  %v576_v49 = vld [vmem:[%s279_s25 + $0x10] sm:$0xff] }
  0x33   : > { %335 = vperm.xlu1 %985, %v317_v43   ;;  %v574_v46 = vld [vmem:[%s279_s25] sm:$0xff]  ;;  %v577_v50 = vld [vmem:[%s279_s25 + $0x18] sm:$0xff]  ;;  %v320_v52 = vld [vmem:[%s1271_s3 + $0x28] sm:$0xff] }
  0x34   : > { %411 = vmatpush1.bf16.msra.mxu0 %v299_v38  ;;  %v319_v51 = vld [vmem:[%s1271_s3 + $0x20] sm:$0xff]  ;;  %v988_v53 = vld [vmem:[%s1270_s2 + $0x10] sm:$0xff]   ;;  %v322_v55 = vld [vmem:[%s1271_s3 + $0x38] sm:$0xff] }
  0x35   : > { %484 = vmatpush1.bf16.msra.mxu1 %v301_v40  ;;  %v321_v54 = vld [vmem:[%s1271_s3 + $0x30] sm:$0xff]  ;;  %v989_v56 = vld [vmem:[%s1270_s2 + $0x18] sm:$0xff]  }
  0x36   : > { %330 = vperm.xlu0 %984, %v316_v44  }
  0x37   : > { %892 = vmatmul.mubr.msk.bf16.vlgmr.msra.gmra.mxu0 %vm383_vm0, %v986_v42  ;;  %340 = vperm.xlu1 %985, %v318_v45  }
  0x38   : > { %896 = vmatmul.mubr.msk.bf16.vlgmr.msra.gmra.mxu1 %vm383_vm0, %v986_v42  ;;  %438 = vmatprep.mubr.bf16.mxu0 %v1062_v16 }
  0x39   : > { %511 = vmatprep.mubr.bf16.mxu1 %v1062_v16 }
  0x3a   : > { %580 = vperm.xlu0 %984, %v574_v46  }
  0x3b   : > { %585 = vperm.xlu1 %985, %v575_v47  }
  0x3e   : > { %590 = vperm.xlu0 %984, %v576_v49  }
  0x3f   : > { %893 = vmatmul.mubr.msk.bf16.gmra.mxu0 %vm383_vm0, %v987_v48  ;;  %595 = vperm.xlu1 %985, %v577_v50  }
  0x40   : > { %897 = vmatmul.mubr.msk.bf16.gmra.mxu1 %vm383_vm0, %v987_v48  ;;  %448 = vmatprep.mubr.bf16.mxu0 %v1062_v16 }
  0x41   : > { %521 = vmatprep.mubr.bf16.mxu1 %v1062_v16 }
  0x42   : > { %345 = vperm.xlu0 %984, %v319_v51  }
  0x43   : > { %350 = vperm.xlu1 %985, %v320_v52  }
  0x46   : > { %355 = vperm.xlu0 %984, %v321_v54  }
  0x47   : > { %894 = vmatmul.mubr.msk.bf16.gmra.mxu0 %vm383_vm0, %v988_v53  ;;  %360 = vperm.xlu1 %985, %v322_v55  }
  0x48   : > { %898 = vmatmul.mubr.msk.bf16.gmra.mxu1 %vm383_vm0, %v988_v53  ;;  %458 = vmatprep.mubr.bf16.mxu0 %v1062_v16 }
  0x49   : > { %531 = vmatprep.mubr.bf16.mxu1 %v1062_v16 }
  0x4f   : > { %895 = vmatmul.mubr.msk.bf16.gmra.mxu0 %vm383_vm0, %v989_v56 }
  0x50   : > { %899 = vmatmul.mubr.msk.bf16.gmra.mxu1 %vm383_vm0, %v989_v56 }
  0xad   : > { %v326_v57 = vpop.permute.xlu0 %325 }
  0xae   : > { %v336_v58 = vpop.permute.xlu1 %335 }
  0xb1   : > { %v331_v59 = vpop.permute.xlu0 %330 }
  0xb2   : > { %v341_v3 = vpop.permute.xlu1 %340 }
  0xb5   : > { %v581_v8 = vpop.permute.xlu0 %580 }
  0xb6   : > { %v586_v24 = vpop.permute.xlu1 %585 }
  0xb9   : > { %v591_v35 = vpop.permute.xlu0 %590 }
  0xba   : > { %v596_v56 = vpop.permute.xlu1 %595 }
  0xf7   : > { %v430_v60 = vpop.f32.mrf.mxu0 }
  0xf8   : > { %v503_v61 = vpop.f32.mrf.mxu1  ;;  %v431_v62 = vadd.f32 %v430_v60, %v326_v57 }
  0xf9   : > { %v504_v63 = vadd.f32 %v503_v61, %v326_v57  ;;  %v432_v0 = vpop.f32.mrf.mxu0 }
  0xfa   : > { %v433_v1 = vadd.f32 %v432_v0, %v326_v57  ;;  %v505_v2 = vpop.f32.mrf.mxu1  ;;  %v542_v9 = vmax.f32 %v431_v62, 0.0 }
  0xfb   : > { %v506_v4 = vadd.f32 %v505_v2, %v326_v57  ;;  %v434_v5 = vpop.f32.mrf.mxu0  ;;  %v544_v10 = vmax.f32 %v504_v63, 0.0 }
  0xfc   : > { %v435_v6 = vadd.f32 %v434_v5, %v331_v59  ;;  %v507_v7 = vpop.f32.mrf.mxu1  ;;  %v543_v13 = vmax.f32 %v433_v1, 0.0  ;;  %v598_v25 = vmul.f32 %v581_v8, %v542_v9 }
  0xfd   : > { %v508_v11 = vadd.f32 %v507_v7, %v331_v59  ;;  %v436_v12 = vpop.f32.mrf.mxu0  ;;  %v545_v17 = vmax.f32 %v506_v4, 0.0  ;;  %v600_v26 = vmul.f32 %v581_v8, %v544_v10 }
  0xfe   : > { %v546_v14 = vmax.f32 %v435_v6, 0.0  ;;  %v437_v15 = vadd.f32 %v436_v12, %v331_v59  ;;  %v509_v16 = vpop.f32.mrf.mxu1  ;;  %v599_v30 = vmul.f32 %v581_v8, %v543_v13 }
  0xff   : > { %v548_v18 = vmax.f32 %v508_v11, 0.0  ;;  %v510_v19 = vadd.f32 %v509_v16, %v331_v59  ;;  %v440_v20 = vpop.f32.mrf.mxu0  ;;  %v601_v36 = vmul.f32 %v581_v8, %v545_v17 }
 0x100   : > { %v547_v21 = vmax.f32 %v437_v15, 0.0  ;;  %v441_v22 = vadd.f32 %v440_v20, %v336_v58  ;;  %v513_v23 = vpop.f32.mrf.mxu1  ;;  %v602_v31 = vmul.f32 %v586_v24, %v546_v14 }
 0x101   : > { %v549_v27 = vmax.f32 %v510_v19, 0.0  ;;  %v514_v28 = vadd.f32 %v513_v23, %v336_v58  ;;  %v442_v29 = vpop.f32.mrf.mxu0  ;;  %v604_v37 = vmul.f32 %v586_v24, %v548_v18 }
 0x102   : > { %v550_v32 = vmax.f32 %v441_v22, 0.0  ;;  %v443_v33 = vadd.f32 %v442_v29, %v336_v58  ;;  %v515_v34 = vpop.f32.mrf.mxu1  ;;  %v603_v41 = vmul.f32 %v586_v24, %v547_v21  ;;  %v614_v51 = vadd.f32 %v602_v31, %v598_v25 }
 0x103   : > { %v552_v38 = vmax.f32 %v514_v28, 0.0  ;;  %v516_v39 = vadd.f32 %v515_v34, %v336_v58  ;;  %v444_v40 = vpop.f32.mrf.mxu0  ;;  %v605_v46 = vmul.f32 %v586_v24, %v549_v27  ;;  %v632_v57 = vadd.f32 %v604_v37, %v600_v26 }
 0x104   : > { %v606_v42 = vmul.f32 %v591_v35, %v550_v32  ;;  %v551_v43 = vmax.f32 %v443_v33, 0.0  ;;  %v445_v44 = vadd.f32 %v444_v40, %v341_v3  ;;  %v517_v45 = vpop.f32.mrf.mxu1  ;;  %v623_v61 = vadd.f32 %v603_v41, %v599_v30 }
 0x105   : > { %v608_v47 = vmul.f32 %v591_v35, %v552_v38  ;;  %v553_v48 = vmax.f32 %v516_v39, 0.0  ;;  %v518_v49 = vadd.f32 %v517_v45, %v341_v3  ;;  %v446_v50 = vpop.f32.mrf.mxu0  ;;  %v641_v1 = vadd.f32 %v605_v46, %v601_v36 }
 0x106   : > { %v607_v52 = vmul.f32 %v591_v35, %v551_v43  ;;  %v554_v53 = vmax.f32 %v445_v44, 0.0  ;;  %v447_v54 = vadd.f32 %v446_v50, %v341_v3  ;;  %v519_v55 = vpop.f32.mrf.mxu1  ;;  %v615_v62 = vadd.f32 %v614_v51, %v606_v42 }
 0x107   : > { %v609_v59 = vmul.f32 %v591_v35, %v553_v48  ;;  %v556_v58 = vmax.f32 %v518_v49, 0.0  ;;  %v520_v60 = vadd.f32 %v519_v55, %v341_v3  ;;  %v633_v2 = vadd.f32 %v632_v57, %v608_v47  ;;  %v450_v29 = vpop.f32.mrf.mxu0 }
 0x108   : > { %v610_v63 = vmul.f32 %v596_v56, %v554_v53  ;;  %v555_v0 = vmax.f32 %v447_v54, 0.0  ;;  %v624_v6 = vadd.f32 %v623_v61, %v607_v52  ;;  %v523_v30 = vpop.f32.mrf.mxu1  ;;  %v351_v61 = vpop.permute.xlu1 %350 }
 0x109   : > { %v612_v4 = vmul.f32 %v596_v56, %v556_v58  ;;  %v557_v5 = vmax.f32 %v520_v60, 0.0  ;;  %v642_v9 = vadd.f32 %v641_v1, %v609_v59  ;;  %v452_v39 = vpop.f32.mrf.mxu0  ;;  %v346_v60 = vpop.permute.xlu0 %345 }
 0x10a   : > { %v616_v7 = vadd.f32 %v615_v62, %v610_v63  ;;  %v611_v8 = vmul.f32 %v596_v56, %v555_v0  ;;  %v525_v40 = vpop.f32.mrf.mxu1  ;;  %v451_v1 = vadd.f32 %v450_v29, %v346_v60 }
 0x10b   : > { %v634_v10 = vadd.f32 %v633_v2, %v612_v4  ;;  %v613_v11 = vmul.f32 %v596_v56, %v557_v5  ;;  %v454_v45 = vpop.f32.mrf.mxu0  ;;  %v524_v2 = vadd.f32 %v523_v30, %v346_v60  ;;  %v453_v4 = vadd.f32 %v452_v39, %v346_v60 }
 0x10c   : > { %v617_v12 = vrot.slane %v616_v7, 4  ;;  %v625_v13 = vadd.f32 %v624_v6, %v611_v8  ;;  %v527_v46 = vpop.f32.mrf.mxu1  ;;  %v526_v5 = vadd.f32 %v525_v40, %v346_v60 }
 0x10d   : > { %v635_v14 = vrot.slane %v634_v10, 4  ;;  %v643_v15 = vadd.f32 %v642_v9, %v613_v11  ;;  %v456_v47 = vpop.f32.mrf.mxu0  ;;  %v356_v8 = vpop.permute.xlu0 %355  ;;  %v528_v11 = vadd.f32 %v527_v46, %v351_v61 }
 0x10e   : > { %v618_v16 = vadd.f32 %v617_v12, %v616_v7  ;;  %v626_v3 = vrot.slane %v625_v13, 4  ;;  %v529_v48 = vpop.f32.mrf.mxu1  ;;  %v361_v9 = vpop.permute.xlu1 %360  ;;  %v457_v12 = vadd.f32 %v456_v47, %v351_v61 }
 0x10f   : > { %v636_v17 = vadd.f32 %v635_v14, %v634_v10  ;;  %v644_v18 = vrot.slane %v643_v15, 4  ;;  %v460_v49 = vpop.f32.mrf.mxu0  ;;  %v455_v10 = vadd.f32 %v454_v45, %v351_v61 }
 0x110   : > { %v619_v19 = vrot.slane %v618_v16, 2  ;;  %v627_v20 = vadd.f32 %v626_v3, %v625_v13  ;;  %v533_v50 = vpop.f32.mrf.mxu1  ;;  %v530_v13 = vadd.f32 %v529_v48, %v351_v61  ;;  %v461_v14 = vadd.f32 %v460_v49, %v356_v8 }
 0x111   : > { %v637_v21 = vrot.slane %v636_v17, 2  ;;  %v645_v22 = vadd.f32 %v644_v18, %v643_v15  ;;  %v462_v54 = vpop.f32.mrf.mxu0  ;;  %v534_v15 = vadd.f32 %v533_v50, %v356_v8 }
 0x112   : > { %v620_v23 = vadd.f32 %v619_v19, %v618_v16  ;;  %v628_v24 = vrot.slane %v627_v20, 2  ;;  %v535_v55 = vpop.f32.mrf.mxu1  ;;  %v463_v16 = vadd.f32 %v462_v54, %v356_v8  ;;  %v566_v29 = vmax.f32 %v461_v14, 0.0 }
 0x113   : > { %v638_v25 = vadd.f32 %v637_v21, %v636_v17  ;;  %v646_v26 = vrot.slane %v645_v22, 2  ;;  %v464_v63 = vpop.f32.mrf.mxu0  ;;  %v536_v17 = vadd.f32 %v535_v55, %v356_v8  ;;  %v558_v21 = vmax.f32 %v451_v1, 0.0 }
 0x114   : > { %v621_v27 = vrot.slane %v620_v23, 1  ;;  %v629_v28 = vadd.f32 %v628_v24, %v627_v20  ;;  %v537_v0 = vpop.f32.mrf.mxu1  ;;  %v465_v3 = vadd.f32 %v464_v63, %v361_v9  ;;  %v561_v24 = vmax.f32 %v526_v5, 0.0 }
 0x115   : > { %v639_v31 = vrot.slane %v638_v25, 1  ;;  %v647_v32 = vadd.f32 %v646_v26, %v645_v22  ;;  %v466_v6 = vpop.f32.mrf.mxu0  ;;  %v538_v18 = vadd.f32 %v537_v0, %v361_v9  ;;  %v560_v22 = vmax.f32 %v524_v2, 0.0 }
 0x116   : > { %v622_v33 = vadd.f32 %v621_v27, %v620_v23  ;;  %v630_v34 = vrot.slane %v629_v28, 1  ;;  %v539_v7 = vpop.f32.mrf.mxu1  ;;  %v467_v19 = vadd.f32 %v466_v6, %v361_v9  ;;  %v559_v23 = vmax.f32 %v453_v4, 0.0 }
 0x117   : > { %v640_v35 = vadd.f32 %v639_v31, %v638_v25  ;;  %v648_v36 = vrot.slane %v647_v32, 1  ;;  %v540_v20 = vadd.f32 %v539_v7, %v361_v9  ;;  %v562_v25 = vmax.f32 %v455_v10, 0.0 }
 0x118   : > { %v900_v37 = vmul.f32 -1.442695, %v622_v33  ;;  %v631_v38 = vadd.f32 %v630_v34, %v629_v28  ;;  %v564_v26 = vmax.f32 %v528_v11, 0.0  ;;  %v563_v27 = vmax.f32 %v457_v12, 0.0 }
 0x119   : > { %v902_v41 = vmul.f32 -1.442695, %v640_v35  ;;  %v649_v42 = vadd.f32 %v648_v36, %v647_v32  ;;  %v565_v28 = vmax.f32 %v530_v13, 0.0  ;;  %v568_v30 = vmax.f32 %v534_v15, 0.0 }
 0x11a   : > { %990 = vpow2.f32 %v900_v37  ;;  %v901_v43 = vmul.f32 -1.442695, %v631_v38  ;;  %v567_v31 = vmax.f32 %v463_v16, 0.0  ;;  %v570_v32 = vmax.f32 %v465_v3, 0.0 }
 0x11b   : > { %992 = vpow2.f32 %v902_v41  ;;  %v903_v44 = vmul.f32 -1.442695, %v649_v42  ;;  %v569_v34 = vmax.f32 %v536_v17, 0.0  ;;  %v572_v35 = vmax.f32 %v538_v18, 0.0 }
 0x11c   : > { %994 = vpow2.f32 %v901_v43  ;;  %v571_v36 = vmax.f32 %v467_v19, 0.0  ;;  %v573_v37 = vmax.f32 %v540_v20, 0.0 }
 0x11d   : > { %996 = vpow2.f32 %v903_v44 }
 0x127   : > { %v991_v51 = vpop.eup %990 }
 0x128   : > { %v993_v52 = vpop.eup %992  ;;  %v662_v53 = vadd.f32 1.0, %v991_v51 }
 0x129   : > { %v995_v56 = vpop.eup %994  ;;  %v664_v57 = vadd.f32 1.0, %v993_v52 }
 0x12a   : > { %v997_v59 = vpop.eup %996  ;;  %998 = vrcp.f32 %v662_v53  ;;  %v663_v58 = vadd.f32 1.0, %v995_v56 }
 0x12b   : > { %1000 = vrcp.f32 %v664_v57  ;;  %v665_v62 = vadd.f32 1.0, %v997_v59 }
 0x12c   : > { %1002 = vrcp.f32 %v663_v58 }
 0x12d   : > { %1004 = vrcp.f32 %v665_v62 }
 0x137   : > { %v999_v33 = vpop.eup %998 }
 0x138   : > { %v1001_v38 = vpop.eup %1000  ;;  %v674_v39 = vmul.f32 %v999_v33, %v558_v21  ;;  %v678_v40 = vmul.f32 %v999_v33, %v562_v25  ;;  %v682_v41 = vmul.f32 %v999_v33, %v566_v29  ;;  %v686_v42 = vmul.f32 %v999_v33, %v570_v32 }
 0x139   : > { %v1003_v43 = vpop.eup %1002  ;;  %v676_v44 = vmul.f32 %v1001_v38, %v560_v22  ;;  %v680_v45 = vmul.f32 %v1001_v38, %v564_v26  ;;  %v684_v46 = vmul.f32 %v1001_v38, %v568_v30  ;;  %v688_v47 = vmul.f32 %v1001_v38, %v572_v35 }
 0x13a   : > { %v1005_v48 = vpop.eup %1004  ;;  %v675_v49 = vmul.f32 %v1003_v43, %v559_v23  ;;  %v679_v50 = vmul.f32 %v1003_v43, %v563_v27  ;;  %v683_v51 = vmul.f32 %v1003_v43, %v567_v31  ;;  %v687_v52 = vmul.f32 %v1003_v43, %v571_v36 }
 0x13b   : > { %v677_v53 = vmul.f32 %v1005_v48, %v561_v24  ;;  %v681_v54 = vmul.f32 %v1005_v48, %v565_v28  ;;  %v685_v55 = vmul.f32 %v1005_v48, %v569_v34  ;;  %v689_v56 = vmul.f32 %v1005_v48, %v573_v37 }
 0x13c   : > { %v919_v57 = vpack.c.bf16 %v675_v49, %v674_v39  ;;  %v921_v59 = vpack.c.bf16 %v679_v50, %v678_v40  ;;  %v923_v58 = vpack.c.bf16 %v683_v51, %v682_v41  ;;  %v925_v60 = vpack.c.bf16 %v687_v52, %v686_v42 }
 0x13d   : > { %v920_v61 = vpack.c.bf16 %v677_v53, %v676_v44  ;;  %v922_v62 = vpack.c.bf16 %v681_v54, %v680_v45  ;;  %v924_v63 = vpack.c.bf16 %v685_v55, %v684_v46  ;;  %v926_v0 = vpack.c.bf16 %v689_v56, %v688_v47  ;;  %752 = sbr.rel (!%p1136_p6) target bundleno = 330 (0x14a), region = 63 }
 0x13e   : > { %738 = vst [vmem:[%s274_s15] sm:$0xff] %v919_v57  ;;  %740 = vst [vmem:[%s274_s15 + $0x10] sm:$0xff] %v921_v59 }
 0x13f   : > { %742 = vst [vmem:[%s274_s15 + $0x20] sm:$0xff] %v923_v58  ;;  %744 = vst [vmem:[%s274_s15 + $0x30] sm:$0xff] %v925_v60 }
 0x140   : > { %739 = vst [vmem:[%s274_s15 + $0x8] sm:$0xff] %v920_v61  ;;  %741 = vst [vmem:[%s274_s15 + $0x18] sm:$0xff] %v922_v62 }
 0x141   : > { %743 = vst [vmem:[%s274_s15 + $0x28] sm:$0xff] %v924_v63  ;;  %745 = vst [vmem:[%s274_s15 + $0x38] sm:$0xff] %v926_v0 }
 0x145   : > { %v770_v1 = vld [vmem:[%s274_s15] sm:$0xff]  ;;  %v774_v4 = vld [vmem:[%s274_s15 + $0x10] sm:$0xff] }
 0x146   : > { %v778_v6 = vld [vmem:[%s274_s15 + $0x20] sm:$0xff]  ;;  %v782_v8 = vld [vmem:[%s274_s15 + $0x30] sm:$0xff]  ;;  %771 = vst [vmem:[%s757_s10] sm:$0xff] %v770_v1  ;;  %775 = vst [vmem:[%s757_s10 + $0x20] sm:$0xff] %v774_v4 }
 0x147   : > { %v772_v2 = vld [vmem:[%s274_s15 + $0x8] sm:$0xff]  ;;  %v776_v5 = vld [vmem:[%s274_s15 + $0x18] sm:$0xff]  ;;  %779 = vst [vmem:[%s757_s10 + $0x40] sm:$0xff] %v778_v6  ;;  %783 = vst [vmem:[%s757_s10 + $0x60] sm:$0xff] %v782_v8 }
 0x148   : > { %v780_v7 = vld [vmem:[%s274_s15 + $0x28] sm:$0xff]  ;;  %v784_v9 = vld [vmem:[%s274_s15 + $0x38] sm:$0xff]  ;;  %773 = vst [vmem:[%s757_s10 + $0x8] sm:$0xff] %v772_v2  ;;  %777 = vst [vmem:[%s757_s10 + $0x28] sm:$0xff] %v776_v5 }
 0x149   : > { %781 = vst [vmem:[%s757_s10 + $0x48] sm:$0xff] %v780_v7  ;;  %785 = vst [vmem:[%s757_s10 + $0x68] sm:$0xff] %v784_v9 }
 0x14a PF: > { %s14_s21 = sadd.s32 1, %s1060_s21   ;;  %s1274_s15 = smov %s1040_s16 }
 0x14b   : > { %p11_p13 = scmp.ge.s32.totalorder %s14_s21, 6   ;;  %s1275_s16 = smov %s1144_s30 }
 0x14c   : > { %s1276_s17 = smov %s1052_s19  ;;  %s1277_s18 = smov %s1056_s20 }
 0x14d   : > { %s1278_s19 = smov %s1281_s22  ;;  %s1279_s20 = smov %s1285_s23 }
 0x14e   :  { %13 = sbr.rel (!%p11_p13) target bundleno = 4 (0x4), region = 120 }

// kernel: _lambda_.3
= control target key start
LH: loop header
LB: loop body
LE: loop exit
PB: predicated region body
PF: predicated region fallthrough
CT: control target
= control target key end

     0   :  { %s965_s15 = smov 0   ;;  %s967_s16 = smov 0   ;;  %s1078_s0 = inlined_call_operand.vmem [shape: f32[2,32,1], index: 0, kind: input, shape index: {}]   ;;  %s1079_s1 = inlined_call_operand.vmem [shape: f32[2,32,512], index: 1, kind: input, shape index: {}]   ;;  %s1080_s2 = inlined_call_operand.vmem [shape: bf16[64,32], index: 2, kind: input, shape index: {}]   ;;  %s1081_s3 = inlined_call_operand.vmem [shape: f32[64,1], index: 3, kind: input, shape index: {}]   ;;  %s1082_s4 = inlined_call_operand.vmem [shape: bf16[2,32,512], index: 4, kind: output, shape index: {}]  }
   0x1   :  { %s969_s17 = smov 0  }
   0x2 LB: > { %s26_s18 = sadd.s32 1, %s933_s16  ;;  %p824_p0 = scmp.ge.s32.totalorder %s937_s17, 1  ;;  %s937_s17 = sphi %s969_s17, %s14_s17   ;;  %s933_s16 = sphi %s967_s16, %s1084_s16   ;;  %s929_s15 = sphi %s965_s15, %s1083_s15  }
   0x3   : > { %p28_p1 = scmp.ge.s32.totalorder %s26_s18, 2  ;;  %p193_p2 = scmp.lt.s32.totalorder %s937_s17, 3 }
   0x5   : > { %s1086_s18 = smov (%p28_p1, %s26_s18), 0  ;;  %p194_p3 = pnand %p824_p0, %p193_p2 }
   0x6   : > { %p232_p4 = scmp.lt.s32.totalorder (!%p194_p3), %s929_s15, 1 }
   0x7   : > { %197 = sbr.rel (%p194_p3) target bundleno = 294 (0x126), region = 36 }
   0xc   : > { %v939_v0 = vmov 0   ;;  %s1088_s15 = smov (!%p232_p4, %s929_s15), 1  ;;  %v290_v1 = vld [vmem:[%s1081_s3] sm:$0xff]  ;;  %v292_v2 = vld [vmem:[%s1081_s3 + $0x10] sm:$0xff]  ;;  %v291_v3 = vld [vmem:[%s1081_s3 + $0x8] sm:$0xff]  ;;  %vm358_vm0 = vcmask 261120  }
   0xd   : > { %403 = vmatprep.mubr.bf16.mxu0 %v939_v0  ;;  %476 = vmatprep.mubr.bf16.mxu1 %v939_v0  ;;  %s858_s19 = sshll.u32 %s1088_s15, 7  ;;  %s857_s29 = sshll.u32 %s1088_s15, 5  ;;  %v293_v7 = vld [vmem:[%s1081_s3 + $0x18] sm:$0xff]  ;;  %v895_v31 = vld [vmem:[%s1080_s2] sm:$0xff]   ;;  %v295_v35 = vld [vmem:[%s1081_s3 + $0x28] sm:$0xff] }
   0xe   : > { %893 = vset.pattern.permute.xlu0 %v939_v0  ;;  %894 = vset.pattern.permute.xlu1 %v939_v0  ;;  %s999_s26 = scalar_lea.vmem %s1079_s1, %s858_s19  ;;  %s236_s8 = scalar_lea.vmem %s1078_s0, %s857_s29  ;;  %v294_v34 = vld [vmem:[%s1081_s3 + $0x20] sm:$0xff]  ;;  %v896_v36 = vld [vmem:[%s1080_s2 + $0x8] sm:$0xff]   ;;  %v296_v37 = vld [vmem:[%s1081_s3 + $0x30] sm:$0xff] }
   0xf   : > { %300 = vperm.xlu0 %893, %v290_v1   ;;  %310 = vperm.xlu1 %894, %v292_v2   ;;  %v267_v4 = vld [vmem:[%s999_s26 + $0x48] sm:$0xff]  ;;  %v269_v6 = vld [vmem:[%s999_s26 + $0x58] sm:$0xff]  ;;  %v266_v10 = vld [vmem:[%s999_s26 + $0x40] sm:$0xff]  ;;  %s859_s29 = sshll.u32 %s1088_s15, 6 }
  0x10   : > { %v271_v5 = vld [vmem:[%s999_s26 + $0x68] sm:$0xff]  ;;  %v273_v9 = vld [vmem:[%s999_s26 + $0x78] sm:$0xff]  ;;  %v270_v11 = vld [vmem:[%s999_s26 + $0x60] sm:$0xff]  ;;  %s255_s6 = scalar_lea.vmem %s1082_s4, %s859_s29 }
  0x11   : > { %v279_v8 = vpack.c.bf16 %v271_v5, %v267_v4  ;;  %v281_v12 = vpack.c.bf16 %v273_v9, %v269_v6  ;;  %v278_v13 = vpack.c.bf16 %v270_v11, %v266_v10  ;;  %v268_v14 = vld [vmem:[%s999_s26 + $0x50] sm:$0xff]  ;;  %v259_v16 = vld [vmem:[%s999_s26 + $0x8] sm:$0xff]  ;;  %v261_v19 = vld [vmem:[%s999_s26 + $0x18] sm:$0xff] }
  0x12   : > { %v272_v15 = vld [vmem:[%s999_s26 + $0x70] sm:$0xff]  ;;  %v263_v18 = vld [vmem:[%s999_s26 + $0x28] sm:$0xff]  ;;  %v265_v20 = vld [vmem:[%s999_s26 + $0x38] sm:$0xff] }
  0x13   : > { %383 = vmatprep.subr.bf16.mxu0 %v279_v8  ;;  %v280_v17 = vpack.c.bf16 %v272_v15, %v268_v14  ;;  %305 = vperm.xlu0 %893, %v291_v3   ;;  %v275_v21 = vpack.c.bf16 %v263_v18, %v259_v16  ;;  %v277_v22 = vpack.c.bf16 %v265_v20, %v261_v19  ;;  %v258_v23 = vld [vmem:[%s999_s26] sm:$0xff]  ;;  %v260_v25 = vld [vmem:[%s999_s26 + $0x10] sm:$0xff]  ;;  %v550_v30 = vld [vmem:[%s236_s8 + $0x8] sm:$0xff] }
  0x14   : > { %456 = vmatprep.subr.bf16.mxu1 %v281_v12  ;;  %384 = vmatpush1.bf16.msra.mxu0 %v278_v13  ;;  %v262_v24 = vld [vmem:[%s999_s26 + $0x20] sm:$0xff]  ;;  %v264_v27 = vld [vmem:[%s999_s26 + $0x30] sm:$0xff]  ;;  %v552_v33 = vld [vmem:[%s236_s8 + $0x18] sm:$0xff] }
  0x15   : > { %457 = vmatpush1.bf16.msra.mxu1 %v280_v17  ;;  %v274_v26 = vpack.c.bf16 %v262_v24, %v258_v23  ;;  %315 = vperm.xlu1 %894, %v293_v7   ;;  %v549_v28 = vld [vmem:[%s236_s8] sm:$0xff]  ;;  %v276_v29 = vpack.c.bf16 %v264_v27, %v260_v25  ;;  %v551_v32 = vld [vmem:[%s236_s8 + $0x10] sm:$0xff]  ;;  %v297_v38 = vld [vmem:[%s1081_s3 + $0x38] sm:$0xff] }
  0x16   : > { %385 = vmatprep.subr.bf16.mxu0 %v275_v21  ;;  %458 = vmatprep.subr.bf16.mxu1 %v277_v22  ;;  %v897_v39 = vld [vmem:[%s1080_s2 + $0x10] sm:$0xff]   ;;  %v898_v40 = vld [vmem:[%s1080_s2 + $0x18] sm:$0xff]  }
  0x17   : > { %555 = vperm.xlu0 %893, %v549_v28  }
  0x18   : > { %386 = vmatpush1.bf16.msra.mxu0 %v274_v26 }
  0x19   : > { %459 = vmatpush1.bf16.msra.mxu1 %v276_v29  ;;  %560 = vperm.xlu1 %894, %v550_v30  }
  0x1b   : > { %835 = vmatmul.mubr.msk.bf16.vlgmr.msra.gmra.mxu0 %vm358_vm0, %v895_v31  ;;  %565 = vperm.xlu0 %893, %v551_v32  }
  0x1c   : > { %839 = vmatmul.mubr.msk.bf16.vlgmr.msra.gmra.mxu1 %vm358_vm0, %v895_v31  ;;  %413 = vmatprep.mubr.bf16.mxu0 %v939_v0 }
  0x1d   : > { %486 = vmatprep.mubr.bf16.mxu1 %v939_v0  ;;  %570 = vperm.xlu1 %894, %v552_v33  }
  0x1f   : > { %320 = vperm.xlu0 %893, %v294_v34  }
  0x21   : > { %325 = vperm.xlu1 %894, %v295_v35  }
  0x23   : > { %836 = vmatmul.mubr.msk.bf16.gmra.mxu0 %vm358_vm0, %v896_v36  ;;  %330 = vperm.xlu0 %893, %v296_v37  }
  0x24   : > { %840 = vmatmul.mubr.msk.bf16.gmra.mxu1 %vm358_vm0, %v896_v36  ;;  %423 = vmatprep.mubr.bf16.mxu0 %v939_v0 }
  0x25   : > { %496 = vmatprep.mubr.bf16.mxu1 %v939_v0  ;;  %335 = vperm.xlu1 %894, %v297_v38  }
  0x2b   : > { %837 = vmatmul.mubr.msk.bf16.gmra.mxu0 %vm358_vm0, %v897_v39 }
  0x2c   : > { %841 = vmatmul.mubr.msk.bf16.gmra.mxu1 %vm358_vm0, %v897_v39  ;;  %433 = vmatprep.mubr.bf16.mxu0 %v939_v0 }
  0x2d   : > { %506 = vmatprep.mubr.bf16.mxu1 %v939_v0 }
  0x33   : > { %838 = vmatmul.mubr.msk.bf16.gmra.mxu0 %vm358_vm0, %v898_v40 }
  0x34   : > { %842 = vmatmul.mubr.msk.bf16.gmra.mxu1 %vm358_vm0, %v898_v40 }
  0x8a   : > { %v301_v41 = vpop.permute.xlu0 %300  ;;  %v311_v42 = vpop.permute.xlu1 %310 }
  0x8e   : > { %v306_v43 = vpop.permute.xlu0 %305 }
  0x90   : > { %v316_v51 = vpop.permute.xlu1 %315 }
  0x92   : > { %v556_v56 = vpop.permute.xlu0 %555 }
  0x94   : > { %v561_v8 = vpop.permute.xlu1 %560 }
  0x96   : > { %v566_v19 = vpop.permute.xlu0 %565 }
  0x98   : > { %v571_v40 = vpop.permute.xlu1 %570 }
  0xdb   : > { %v405_v44 = vpop.f32.mrf.mxu0 }
  0xdc   : > { %v478_v45 = vpop.f32.mrf.mxu1  ;;  %v406_v46 = vadd.f32 %v405_v44, %v301_v41 }
  0xdd   : > { %v479_v47 = vadd.f32 %v478_v45, %v301_v41  ;;  %v407_v48 = vpop.f32.mrf.mxu0 }
  0xde   : > { %v408_v49 = vadd.f32 %v407_v48, %v301_v41  ;;  %v480_v50 = vpop.f32.mrf.mxu1  ;;  %v517_v57 = vmax.f32 %v406_v46, 0.0 }
  0xdf   : > { %v481_v52 = vadd.f32 %v480_v50, %v301_v41  ;;  %v409_v53 = vpop.f32.mrf.mxu0  ;;  %v519_v58 = vmax.f32 %v479_v47, 0.0 }
  0xe0   : > { %v410_v54 = vadd.f32 %v409_v53, %v306_v43  ;;  %v482_v55 = vpop.f32.mrf.mxu1  ;;  %v518_v61 = vmax.f32 %v408_v49, 0.0  ;;  %v573_v9 = vmul.f32 %v556_v56, %v517_v57 }
  0xe1   : > { %v483_v59 = vadd.f32 %v482_v55, %v306_v43  ;;  %v411_v60 = vpop.f32.mrf.mxu0  ;;  %v520_v1 = vmax.f32 %v481_v52, 0.0  ;;  %v575_v10 = vmul.f32 %v556_v56, %v519_v58 }
  0xe2   : > { %v521_v62 = vmax.f32 %v410_v54, 0.0  ;;  %v412_v63 = vadd.f32 %v411_v60, %v306_v43  ;;  %v484_v0 = vpop.f32.mrf.mxu1  ;;  %v574_v14 = vmul.f32 %v556_v56, %v518_v61 }
  0xe3   : > { %v523_v2 = vmax.f32 %v483_v59, 0.0  ;;  %v485_v3 = vadd.f32 %v484_v0, %v306_v43  ;;  %v415_v4 = vpop.f32.mrf.mxu0  ;;  %v576_v20 = vmul.f32 %v556_v56, %v520_v1 }
  0xe4   : > { %v522_v5 = vmax.f32 %v412_v63, 0.0  ;;  %v416_v6 = vadd.f32 %v415_v4, %v311_v42  ;;  %v488_v7 = vpop.f32.mrf.mxu1  ;;  %v577_v15 = vmul.f32 %v561_v8, %v521_v62 }
  0xe5   : > { %v524_v11 = vmax.f32 %v485_v3, 0.0  ;;  %v489_v12 = vadd.f32 %v488_v7, %v311_v42  ;;  %v417_v13 = vpop.f32.mrf.mxu0  ;;  %v579_v21 = vmul.f32 %v561_v8, %v523_v2 }
  0xe6   : > { %v525_v16 = vmax.f32 %v416_v6, 0.0  ;;  %v418_v17 = vadd.f32 %v417_v13, %v311_v42  ;;  %v490_v18 = vpop.f32.mrf.mxu1  ;;  %v578_v25 = vmul.f32 %v561_v8, %v522_v5  ;;  %v589_v35 = vadd.f32 %v577_v15, %v573_v9 }
  0xe7   : > { %v527_v22 = vmax.f32 %v489_v12, 0.0  ;;  %v491_v23 = vadd.f32 %v490_v18, %v311_v42  ;;  %v419_v24 = vpop.f32.mrf.mxu0  ;;  %v580_v30 = vmul.f32 %v561_v8, %v524_v11  ;;  %v607_v41 = vadd.f32 %v579_v21, %v575_v10 }
  0xe8   : > { %v581_v26 = vmul.f32 %v566_v19, %v525_v16  ;;  %v526_v27 = vmax.f32 %v418_v17, 0.0  ;;  %v420_v28 = vadd.f32 %v419_v24, %v316_v51  ;;  %v492_v29 = vpop.f32.mrf.mxu1  ;;  %v598_v45 = vadd.f32 %v578_v25, %v574_v14 }
  0xe9   : > { %v583_v31 = vmul.f32 %v566_v19, %v527_v22  ;;  %v528_v32 = vmax.f32 %v491_v23, 0.0  ;;  %v493_v33 = vadd.f32 %v492_v29, %v316_v51  ;;  %v421_v34 = vpop.f32.mrf.mxu0  ;;  %v616_v49 = vadd.f32 %v580_v30, %v576_v20 }
  0xea   : > { %v582_v36 = vmul.f32 %v566_v19, %v526_v27  ;;  %v529_v37 = vmax.f32 %v420_v28, 0.0  ;;  %v422_v38 = vadd.f32 %v421_v34, %v316_v51  ;;  %v494_v39 = vpop.f32.mrf.mxu1  ;;  %v590_v46 = vadd.f32 %v589_v35, %v581_v26 }
  0xeb   : > { %v584_v43 = vmul.f32 %v566_v19, %v528_v32  ;;  %v531_v42 = vmax.f32 %v493_v33, 0.0  ;;  %v495_v44 = vadd.f32 %v494_v39, %v316_v51  ;;  %v608_v50 = vadd.f32 %v607_v41, %v583_v31  ;;  %v425_v13 = vpop.f32.mrf.mxu0 }
  0xec   : > { %v585_v47 = vmul.f32 %v571_v40, %v529_v37  ;;  %v530_v48 = vmax.f32 %v422_v38, 0.0  ;;  %v599_v54 = vadd.f32 %v598_v45, %v582_v36  ;;  %v498_v14 = vpop.f32.mrf.mxu1  ;;  %v326_v45 = vpop.permute.xlu1 %325 }
  0xed   : > { %v587_v52 = vmul.f32 %v571_v40, %v531_v42  ;;  %v532_v53 = vmax.f32 %v495_v44, 0.0  ;;  %v617_v57 = vadd.f32 %v616_v49, %v584_v43  ;;  %v427_v23 = vpop.f32.mrf.mxu0  ;;  %v321_v44 = vpop.permute.xlu0 %320 }
  0xee   : > { %v591_v55 = vadd.f32 %v590_v46, %v585_v47  ;;  %v586_v56 = vmul.f32 %v571_v40, %v530_v48  ;;  %v500_v24 = vpop.f32.mrf.mxu1  ;;  %v426_v49 = vadd.f32 %v425_v13, %v321_v44 }
  0xef   : > { %v609_v58 = vadd.f32 %v608_v50, %v587_v52  ;;  %v588_v59 = vmul.f32 %v571_v40, %v532_v53  ;;  %v429_v29 = vpop.f32.mrf.mxu0  ;;  %v499_v50 = vadd.f32 %v498_v14, %v321_v44  ;;  %v428_v52 = vadd.f32 %v427_v23, %v321_v44 }
  0xf0   : > { %v592_v60 = vrot.slane %v591_v55, 4  ;;  %v600_v61 = vadd.f32 %v599_v54, %v586_v56  ;;  %v502_v30 = vpop.f32.mrf.mxu1  ;;  %v501_v53 = vadd.f32 %v500_v24, %v321_v44 }
  0xf1   : > { %v610_v62 = vrot.slane %v609_v58, 4  ;;  %v618_v63 = vadd.f32 %v617_v57, %v588_v59  ;;  %v431_v31 = vpop.f32.mrf.mxu0  ;;  %v331_v56 = vpop.permute.xlu0 %330  ;;  %v503_v59 = vadd.f32 %v502_v30, %v326_v45 }
  0xf2   : > { %v593_v0 = vadd.f32 %v592_v60, %v591_v55  ;;  %v601_v51 = vrot.slane %v600_v61, 4  ;;  %v504_v32 = vpop.f32.mrf.mxu1  ;;  %v336_v57 = vpop.permute.xlu1 %335  ;;  %v432_v60 = vadd.f32 %v431_v31, %v326_v45 }
  0xf3   : > { %v611_v1 = vadd.f32 %v610_v62, %v609_v58  ;;  %v619_v2 = vrot.slane %v618_v63, 4  ;;  %v435_v33 = vpop.f32.mrf.mxu0  ;;  %v430_v58 = vadd.f32 %v429_v29, %v326_v45 }
  0xf4   : > { %v594_v3 = vrot.slane %v593_v0, 2  ;;  %v602_v4 = vadd.f32 %v601_v51, %v600_v61  ;;  %v508_v34 = vpop.f32.mrf.mxu1  ;;  %v505_v61 = vadd.f32 %v504_v32, %v326_v45  ;;  %v436_v62 = vadd.f32 %v435_v33, %v331_v56 }
  0xf5   : > { %v612_v5 = vrot.slane %v611_v1, 2  ;;  %v620_v6 = vadd.f32 %v619_v2, %v618_v63  ;;  %v437_v38 = vpop.f32.mrf.mxu0  ;;  %v509_v63 = vadd.f32 %v508_v34, %v331_v56 }
  0xf6   : > { %v595_v7 = vadd.f32 %v594_v3, %v593_v0  ;;  %v603_v8 = vrot.slane %v602_v4, 2  ;;  %v510_v39 = vpop.f32.mrf.mxu1  ;;  %v438_v0 = vadd.f32 %v437_v38, %v331_v56  ;;  %v541_v13 = vmax.f32 %v436_v62, 0.0 }
  0xf7   : > { %v613_v9 = vadd.f32 %v612_v5, %v611_v1  ;;  %v621_v10 = vrot.slane %v620_v6, 2  ;;  %v439_v47 = vpop.f32.mrf.mxu0  ;;  %v511_v1 = vadd.f32 %v510_v39, %v331_v56  ;;  %v533_v5 = vmax.f32 %v426_v49, 0.0 }
  0xf8   : > { %v596_v11 = vrot.slane %v595_v7, 1  ;;  %v604_v12 = vadd.f32 %v603_v8, %v602_v4  ;;  %v512_v48 = vpop.f32.mrf.mxu1  ;;  %v440_v51 = vadd.f32 %v439_v47, %v336_v57  ;;  %v536_v8 = vmax.f32 %v501_v53, 0.0 }
  0xf9   : > { %v614_v15 = vrot.slane %v613_v9, 1  ;;  %v622_v16 = vadd.f32 %v621_v10, %v620_v6  ;;  %v441_v54 = vpop.f32.mrf.mxu0  ;;  %v513_v2 = vadd.f32 %v512_v48, %v336_v57  ;;  %v535_v6 = vmax.f32 %v499_v50, 0.0 }
  0xfa   : > { %v597_v17 = vadd.f32 %v596_v11, %v595_v7  ;;  %v605_v18 = vrot.slane %v604_v12, 1  ;;  %v514_v55 = vpop.f32.mrf.mxu1  ;;  %v442_v3 = vadd.f32 %v441_v54, %v336_v57  ;;  %v534_v7 = vmax.f32 %v428_v52, 0.0 }
  0xfb   : > { %v615_v19 = vadd.f32 %v614_v15, %v613_v9  ;;  %v623_v20 = vrot.slane %v622_v16, 1  ;;  %v515_v4 = vadd.f32 %v514_v55, %v336_v57  ;;  %v537_v9 = vmax.f32 %v430_v58, 0.0 }
  0xfc   : > { %v843_v21 = vmul.f32 -1.442695, %v597_v17  ;;  %v606_v22 = vadd.f32 %v605_v18, %v604_v12  ;;  %v539_v10 = vmax.f32 %v503_v59, 0.0  ;;  %v538_v11 = vmax.f32 %v432_v60, 0.0 }
  0xfd   : > { %v845_v25 = vmul.f32 -1.442695, %v615_v19  ;;  %v624_v26 = vadd.f32 %v623_v20, %v622_v16  ;;  %v540_v12 = vmax.f32 %v505_v61, 0.0  ;;  %v543_v14 = vmax.f32 %v509_v63, 0.0 }
  0xfe   : > { %899 = vpow2.f32 %v843_v21  ;;  %v844_v27 = vmul.f32 -1.442695, %v606_v22  ;;  %v542_v15 = vmax.f32 %v438_v0, 0.0  ;;  %v545_v16 = vmax.f32 %v440_v51, 0.0 }
  0xff   : > { %901 = vpow2.f32 %v845_v25  ;;  %v846_v28 = vmul.f32 -1.442695, %v624_v26  ;;  %v544_v18 = vmax.f32 %v511_v1, 0.0  ;;  %v547_v19 = vmax.f32 %v513_v2, 0.0 }
 0x100   : > { %903 = vpow2.f32 %v844_v27  ;;  %v546_v20 = vmax.f32 %v442_v3, 0.0  ;;  %v548_v21 = vmax.f32 %v515_v4, 0.0 }
 0x101   : > { %905 = vpow2.f32 %v846_v28 }
 0x10b   : > { %v900_v35 = vpop.eup %899 }
 0x10c   : > { %v902_v36 = vpop.eup %901  ;;  %v637_v37 = vadd.f32 1.0, %v900_v35 }
 0x10d   : > { %v904_v40 = vpop.eup %903  ;;  %v639_v41 = vadd.f32 1.0, %v902_v36 }
 0x10e   : > { %v906_v43 = vpop.eup %905  ;;  %907 = vrcp.f32 %v637_v37  ;;  %v638_v42 = vadd.f32 1.0, %v904_v40 }
 0x10f   : > { %909 = vrcp.f32 %v639_v41  ;;  %v640_v46 = vadd.f32 1.0, %v906_v43 }
 0x110   : > { %911 = vrcp.f32 %v638_v42 }
 0x111   : > { %913 = vrcp.f32 %v640_v46 }
 0x11b   : > { %v908_v17 = vpop.eup %907 }
 0x11c   : > { %v910_v22 = vpop.eup %909  ;;  %v649_v23 = vmul.f32 %v908_v17, %v533_v5  ;;  %v653_v24 = vmul.f32 %v908_v17, %v537_v9  ;;  %v657_v25 = vmul.f32 %v908_v17, %v541_v13  ;;  %v661_v26 = vmul.f32 %v908_v17, %v545_v16 }
 0x11d   : > { %v912_v27 = vpop.eup %911  ;;  %v651_v28 = vmul.f32 %v910_v22, %v535_v6  ;;  %v655_v29 = vmul.f32 %v910_v22, %v539_v10  ;;  %v659_v30 = vmul.f32 %v910_v22, %v543_v14  ;;  %v663_v31 = vmul.f32 %v910_v22, %v547_v19 }
 0x11e   : > { %v914_v32 = vpop.eup %913  ;;  %v650_v33 = vmul.f32 %v912_v27, %v534_v7  ;;  %v654_v34 = vmul.f32 %v912_v27, %v538_v11  ;;  %v658_v35 = vmul.f32 %v912_v27, %v542_v15  ;;  %v662_v36 = vmul.f32 %v912_v27, %v546_v20 }
 0x11f   : > { %v652_v37 = vmul.f32 %v914_v32, %v536_v8  ;;  %v656_v38 = vmul.f32 %v914_v32, %v540_v12  ;;  %v660_v39 = vmul.f32 %v914_v32, %v544_v18  ;;  %v664_v40 = vmul.f32 %v914_v32, %v548_v21 }
 0x120   : > { %v860_v41 = vpack.c.bf16 %v650_v33, %v649_v23  ;;  %v862_v43 = vpack.c.bf16 %v654_v34, %v653_v24  ;;  %v864_v42 = vpack.c.bf16 %v658_v35, %v657_v25  ;;  %v866_v44 = vpack.c.bf16 %v662_v36, %v661_v26 }
 0x121   : > { %v861_v45 = vpack.c.bf16 %v652_v37, %v651_v28  ;;  %v863_v46 = vpack.c.bf16 %v656_v38, %v655_v29  ;;  %v865_v47 = vpack.c.bf16 %v660_v39, %v659_v30  ;;  %v867_v48 = vpack.c.bf16 %v664_v40, %v663_v31 }
 0x122   : > { %713 = vst [vmem:[%s255_s6] sm:$0xff] %v860_v41  ;;  %715 = vst [vmem:[%s255_s6 + $0x10] sm:$0xff] %v862_v43 }
 0x123   : > { %717 = vst [vmem:[%s255_s6 + $0x20] sm:$0xff] %v864_v42  ;;  %719 = vst [vmem:[%s255_s6 + $0x30] sm:$0xff] %v866_v44 }
 0x124   : > { %714 = vst [vmem:[%s255_s6 + $0x8] sm:$0xff] %v861_v45  ;;  %716 = vst [vmem:[%s255_s6 + $0x18] sm:$0xff] %v863_v46 }
 0x125   : > { %718 = vst [vmem:[%s255_s6 + $0x28] sm:$0xff] %v865_v47  ;;  %720 = vst [vmem:[%s255_s6 + $0x38] sm:$0xff] %v867_v48 }
 0x126 PF: > { %s14_s17 = sadd.s32 1, %s937_s17   ;;  %s1083_s15 = smov %s933_s16 }
 0x127   : > { %p11_p5 = scmp.ge.s32.totalorder %s14_s17, 4   ;;  %s1084_s16 = smov %s1086_s18 }
 0x129   :  { %13 = sbr.rel (!%p11_p5) target bundleno = 2 (0x2), region = 69 }

</bundles_post_ra>
